<compile_context>
chip_gen: v7x
topology: tpu7x:2x2x1
jax: 0.10.0
libtpu: 0.0.40
codegen_flags: <defaults>
</compile_context>

<pallas_src>
import jax
import jax.numpy as jnp
import numpy as np
from jax.experimental import pallas as pl
from jax.experimental.pallas import tpu as pltpu

_CHUNK = 128  # lane width == contiguous sample chunk per matmul row


def _round_up(a, b):
    return ((a + b - 1) // b) * b


def _dft_mag_kernel(x_ref, a_ref, b_ref, out_ref):
    """Y = X @ A + shift_up(X) @ B ; out = |Y|, columns laid out as [Re | Im]."""
    x = x_ref[...]
    # Row r of `xn` is row r+1 of `x` (the next 128-sample chunk).  The value
    # wrapped into the last row is irrelevant: no *real* window starting in the
    # last chunk row of a channel ever crosses into the next chunk (it would
    # have to read samples >= S).  pltpu.roll(axis=0) would be the XLU-cheap
    # alternative; explicit concatenate keeps the shift direction unambiguous.
    xn = jnp.concatenate([x[1:, :], x[:1, :]], axis=0)
    y = jnp.dot(x, a_ref[...], preferred_element_type=jnp.float32)
    y = y + jnp.dot(xn, b_ref[...], preferred_element_type=jnp.float32)
    L = out_ref.shape[-1]
    re = y[:, :L]
    im = y[:, L:]
    out_ref[...] = jnp.sqrt(re * re + im * im).astype(out_ref.dtype)


def _dft_mag_kernel_no_ov(x_ref, a_ref, out_ref):
    """Variant for step >= window_size: no window crosses a chunk boundary."""
    y = jnp.dot(x_ref[...], a_ref[...], preferred_element_type=jnp.float32)
    L = out_ref.shape[-1]
    re = y[:, :L]
    im = y[:, L:]
    out_ref[...] = jnp.sqrt(re * re + im * im).astype(out_ref.dtype)


def _build_bases(window_size, step, nwc, compute_dtype):
    """Fold unfold (x) Hann (x) DFT into per-chunk bases A (same chunk) / Bm (next chunk)."""
    W = window_size
    n = np.arange(W, dtype=np.float64)
    hann = 0.5 * (1.0 - np.cos(2.0 * np.pi * n / W))        # periodic Hann (torch default)
    ang = 2.0 * np.pi * np.outer(n, np.arange(W)) / W
    cosb = hann[:, None] * np.cos(ang)                      # (W, W): sample n -> Re[k]
    sinb = hann[:, None] * (-np.sin(ang))                   # (W, W): sample n -> Im[k]
    L = nwc * W
    A = np.zeros((_CHUNK, 2 * L), np.float64)
    Bm = np.zeros((_CHUNK, 2 * L), np.float64)
    for j in range(nwc):
        o = j * step                                        # window-start offset in chunk
        for ni in range(W):
            s = o + ni                                      # sample position (< 256)
            tgt = A if s < _CHUNK else Bm
            tgt[s % _CHUNK, j * W:(j + 1) * W] = cosb[ni]
            tgt[s % _CHUNK, L + j * W:L + (j + 1) * W] = sinb[ni]
    return (jnp.asarray(A, dtype=compute_dtype),
            jnp.asarray(Bm, dtype=compute_dtype))


def feature_extractor_spec(x, window_size, overlap, *, compute_dtype=jnp.float32):
    """x: (B, C, S) -> (B, C, num_windows, window_size) = |FFT(hann * unfold(x))|."""
    B, C, S = x.shape
    W = int(window_size)
    step = W - int(overlap)
    if step <= 0:
        raise ValueError(f"window_size ({W}) must be greater than overlap ({overlap})")
    if S < W:
        raise ValueError(f"seq_length ({S}) must be >= window_size ({W})")
    nw = (S - W) // step + 1
    out_dtype = jnp.float32

    # Fast path requires window starts to line up identically in every 128-sample
    # chunk (step | 128) and each window to cross at most one chunk boundary.
    if (_CHUNK % step != 0) or (W > _CHUNK + step):
        # TODO(synk): cover irregular (window_size, overlap) pairs with a
        # lane-packed-slab Pallas kernel instead of plain XLA.
        idx = (jnp.arange(nw) * step)[:, None] + jnp.arange(W)[None, :]
        n = jnp.arange(W, dtype=jnp.float32)
        hann = 0.5 * (1.0 - jnp.cos(2.0 * jnp.pi * n / W))
        return jnp.abs(jnp.fft.fft(x[:, :, idx] * hann, axis=-1)).astype(out_dtype)

    BC = B * C
    nwc = _CHUNK // step                      # windows starting per 128-sample chunk
    L = nwc * W                               # output lanes per chunk row
    n_chunk = -(-S // _CHUNK)
    n_chunk_pad = _round_up(n_chunk, 8)       # sublane-aligned chunk rows per channel
    S_pad = n_chunk_pad * _CHUNK

    # Channels per grid step: tiles big enough for the MXU / pipeline, small enough
    # for VMEM, and enough grid steps for v7x's two TensorCores (>= ~4 when BC allows).
    bytes_per_row = 4 * (_CHUNK + 3 * L)      # input + output + f32 intermediate
    vmem_rows = max(8, (6 * 1024 * 1024 // bytes_per_row) // 8 * 8)
    target_rows = min(2048, vmem_rows)
    gch = max(1, min(BC, target_rows // n_chunk_pad)) if n_chunk_pad <= target_rows else 1
    gch = min(gch, max(1, BC // 4))
    num_groups = -(-BC // gch)
    BC_pad = num_groups * gch
    rows_per_block = gch * n_chunk_pad
    # TODO(synk): for a single enormous channel (whole-channel tile exceeding VMEM)
    # the chunk-row axis should also be tiled (needs an element-shifted second view
    # of x for the tile-boundary row).

    # Single fused pad (channels + samples); every other host-side reshape is a view.
    x2 = jnp.pad(x.reshape(BC, S).astype(compute_dtype),
                 ((0, BC_pad - BC), (0, S_pad - S)))
    x_rows = x2.reshape(BC_pad * n_chunk_pad, _CHUNK)

    basis_a, basis_b = _build_bases(W, step, nwc, compute_dtype)
    has_overflow = W > step                   # some window spills into the next chunk

    in_specs = [
        pl.BlockSpec((rows_per_block, _CHUNK), lambda i: (i, 0)),
        pl.BlockSpec((_CHUNK, 2 * L), lambda i: (0, 0)),     # resident basis
    ]
    args = [x_rows, basis_a]
    if has_overflow:
        in_specs.append(pl.BlockSpec((_CHUNK, 2 * L), lambda i: (0, 0)))
        args.append(basis_b)
        kernel = _dft_mag_kernel
    else:
        kernel = _dft_mag_kernel_no_ov

    out = pl.pallas_call(
        kernel,
        out_shape=jax.ShapeDtypeStruct((BC_pad * n_chunk_pad, L), out_dtype),
        grid_spec=pltpu.PrefetchScalarGridSpec(
            num_scalar_prefetch=0,
            grid=(num_groups,),
            in_specs=in_specs,
            out_specs=pl.BlockSpec((rows_per_block, L), lambda i: (i, 0)),
        ),
        compiler_params=pltpu.CompilerParams(
            dimension_semantics=("parallel",)),
    )(*args)

    # rows -> (channel, chunk); lanes -> (window-in-chunk, W); window index is
    # chunk * nwc + within-chunk index, so a plain reshape orders windows correctly.
    out = out.reshape(BC_pad, n_chunk_pad * nwc, W)[:BC, :nw, :]
    return out.reshape(B, C, nw, W)


def _reference(x, window_size, overlap):
    W = window_size
    step = W - overlap
    S = x.shape[-1]
    nw = (S - W) // step + 1
    idx = (jnp.arange(nw) * step)[:, None] + jnp.arange(W)[None, :]
    n = jnp.arange(W, dtype=jnp.float32)
    hann = 0.5 * (1.0 - jnp.cos(2.0 * jnp.pi * n / W))   # torch.hann_window(W) (periodic)
    return jnp.abs(jnp.fft.fft(x[:, :, idx] * hann, axis=-1)).astype(jnp.float32)


if __name__ == "__main__":
    key = jax.random.PRNGKey(0)
    # Config 1: small 50%-overlap case; some windows cross 128-sample chunk boundaries.
    # Config 2: module-default-style window (W=256, overlap=128): every window spans
    #           two chunks, exercising the overflow basis end to end.
    configs = [
        dict(B=2, C=3, S=200, window_size=16, overlap=8),
        dict(B=1, C=2, S=640, window_size=256, overlap=128),
    ]
    for cfg in configs:
        key, sub = jax.random.split(key)
        x = jax.random.normal(sub, (cfg["B"], cfg["C"], cfg["S"]), dtype=jnp.float32)
        out = feature_extractor_spec(x, cfg["window_size"], cfg["overlap"])
        out = jax.block_until_ready(out)
        ref = _reference(x, cfg["window_size"], cfg["overlap"])
        step = cfg["window_size"] - cfg["overlap"]
        nw = (cfg["S"] - cfg["window_size"]) // step + 1
        assert out.shape == (cfg["B"], cfg["C"], nw, cfg["window_size"]), out.shape
        np.testing.assert_allclose(np.asarray(out), np.asarray(ref), rtol=2e-3, atol=2e-3)
    print("KERNEL_OK")
</pallas_src>

<mosaic_0001>
module attributes {stable_mosaic.version = 11 : i64} {
  func.func @_dft_mag_kernel(%arg0: i32, %arg1: memref<8x128xf32, #tpu.memory_space<vmem>>, %arg2: memref<128x512xf32, #tpu.memory_space<vmem>>, %arg3: memref<128x512xf32, #tpu.memory_space<vmem>>, %arg4: memref<8x256xf32, #tpu.memory_space<vmem>>) attributes {dimension_semantics = [#tpu.dimension_semantics<parallel>], iteration_bounds = array<i64: 6>, scalar_prefetch = 0 : i64, scratch_operands = 0 : i64, tpu.core_type = #tpu.core_type<tc>, window_params = [{transform_indices = @transform_0, window_bounds = array<i64: 8, 128>}, {pipeline_mode = #tpu.pipeline_mode<synchronous>, transform_indices = @transform_1, window_bounds = array<i64: 128, 512>}, {pipeline_mode = #tpu.pipeline_mode<synchronous>, transform_indices = @transform_2, window_bounds = array<i64: 128, 512>}, {transform_indices = @transform_3, window_bounds = array<i64: 8, 256>}]} {
    %c0 = arith.constant 0 : index
    %c0_0 = arith.constant 0 : index
    %0 = vector.load %arg1[%c0, %c0_0] : memref<8x128xf32, #tpu.memory_space<vmem>>, vector<8x128xf32>
    %1 = vector.extract_strided_slice %0 {offsets = [1, 0], sizes = [7, 128], strides = [1, 1]} : vector<8x128xf32> to vector<7x128xf32>
    %2 = vector.extract_strided_slice %0 {offsets = [0, 0], sizes = [1, 128], strides = [1, 1]} : vector<8x128xf32> to vector<1x128xf32>
    %3 = tpu.concatenate %1, %2 in 0 : vector<7x128xf32>, vector<1x128xf32> -> vector<8x128xf32>
    %c0_1 = arith.constant 0 : index
    %c0_2 = arith.constant 0 : index
    %4 = vector.load %arg2[%c0_1, %c0_2] : memref<128x512xf32, #tpu.memory_space<vmem>>, vector<128x512xf32>
    %cst = arith.constant dense<0.000000e+00> : vector<8x512xf32>
    %5 = tpu.matmul %0, %4, %cst {dimension_numbers = #tpu.dot_dimension_numbers<[1], [0], [0], [1], [0, 0, 1, 1], [], []>} : vector<8x128xf32>, vector<128x512xf32>, vector<8x512xf32> -> vector<8x512xf32>
    %c0_3 = arith.constant 0 : index
    %c0_4 = arith.constant 0 : index
    %6 = vector.load %arg3[%c0_3, %c0_4] : memref<128x512xf32, #tpu.memory_space<vmem>>, vector<128x512xf32>
    %cst_5 = arith.constant dense<0.000000e+00> : vector<8x512xf32>
    %7 = tpu.matmul %3, %6, %cst_5 {dimension_numbers = #tpu.dot_dimension_numbers<[1], [0], [0], [1], [0, 0, 1, 1], [], []>} : vector<8x128xf32>, vector<128x512xf32>, vector<8x512xf32> -> vector<8x512xf32>
    %8 = arith.addf %5, %7 : vector<8x512xf32>
    %9 = vector.extract_strided_slice %8 {offsets = [0, 0], sizes = [8, 256], strides = [1, 1]} : vector<8x512xf32> to vector<8x256xf32>
    %10 = vector.extract_strided_slice %8 {offsets = [0, 256], sizes = [8, 256], strides = [1, 1]} : vector<8x512xf32> to vector<8x256xf32>
    %11 = arith.mulf %9, %9 : vector<8x256xf32>
    %12 = arith.mulf %10, %10 : vector<8x256xf32>
    %13 = arith.addf %11, %12 : vector<8x256xf32>
    %14 = math.sqrt %13 : vector<8x256xf32>
    %c0_6 = arith.constant 0 : index
    %c0_7 = arith.constant 0 : index
    %15 = vector.load %arg4[%c0_6, %c0_7] : memref<8x256xf32, #tpu.memory_space<vmem>>, vector<8x256xf32>
    tpu.vector_store %arg4[%c0_6, %c0_7], %14 {strides = array<i32>} : memref<8x256xf32, #tpu.memory_space<vmem>>, vector<8x256xf32>,
    return
  }
  func.func @transform_0(%arg0: i32) -> (i32, i32) {
    %c0_i32 = arith.constant 0 : i32
    %c0_i32_0 = arith.constant 0 : i32
    return %arg0, %c0_i32 : i32, i32
  }
  func.func @transform_1(%arg0: i32) -> (i32, i32) {
    %c0_i32 = arith.constant 0 : i32
    %c0_i32_0 = arith.constant 0 : i32
    %c0_i32_1 = arith.constant 0 : i32
    return %c0_i32, %c0_i32_0 : i32, i32
  }
  func.func @transform_2(%arg0: i32) -> (i32, i32) {
    %c0_i32 = arith.constant 0 : i32
    %c0_i32_0 = arith.constant 0 : i32
    %c0_i32_1 = arith.constant 0 : i32
    return %c0_i32, %c0_i32_0 : i32, i32
  }
  func.func @transform_3(%arg0: i32) -> (i32, i32) {
    %c0_i32 = arith.constant 0 : i32
    %c0_i32_0 = arith.constant 0 : i32
    return %arg0, %c0_i32 : i32, i32
  }
}

</mosaic_0001>

<bundles_post_ra>
// kernel: tpu_custom_call.1
= control target key start
LH: loop header
LB: loop body
LE: loop exit
PB: predicated region body
PF: predicated region fallthrough
CT: control target
= control target key end

     0   :  { %8 = vsyncpa [#allocation3], 0  ;;  %s1401_s0 = inlined_call_operand.hbm [shape: f32[48,128], index: 0, kind: input, shape index: {}]   ;;  %s1402_s1 = inlined_call_operand.hbm [shape: f32[128,512], index: 1, kind: input, shape index: {}]   ;;  %s1403_s2 = inlined_call_operand.hbm [shape: f32[128,512], index: 2, kind: input, shape index: {}]   ;;  %s1404_s3 = inlined_call_operand.hbm [shape: f32[48,256], index: 3, kind: output, shape index: {}]  }
   0x1   :  { %10 = vsyncpa [#allocation3 + $0x1], 0 }
   0x2   :  { %11 = vsyncpa [#allocation6], 0 }
   0x3   :  { %12 = vsyncpa [#allocation4], 0 }
   0x4   :  { %14 = vsyncpa [#allocation4 + $0x1], 0  ;;  %s1168_s12 = smov 0   ;;  %s1170_s13 = smov 0  }
   0x5   :  { %s1172_s14 = smov 0   ;;  %s1174_s15 = smov 0  }
   0x6 LB: > { %s1189_s16 = sadd.s32 4294967295, %s1139_s15   ;;  %s759_s17 = sadd.s32 4294967294, %s1139_s15   ;;  %s1139_s15 = sphi %s1174_s15, %s1423_s15   ;;  %s1135_s14 = sphi %s1172_s14, %s1422_s14   ;;  %s1131_s13 = sphi %s1170_s13, %s1421_s13   ;;  %s1127_s12 = sphi %s1168_s12, %s1420_s12  }
   0x7   : > { %p40_p0 = scmp.ne.s32.totalorder %s1131_s13, %s1127_s12  ;;  %p1405_p1 = scmp.eq.s32.totalorder %s1189_s16, 0 }
   0x8   : > { %p112_p3 = scmp.eq.s32.totalorder %s759_s17, 5  ;;  %p760_p5 = scmp.ge.s32.totalorder %s1139_s15, 1 }
   0x9   : > { %p1198_p4 = por %p1405_p1, %p40_p0  ;;  %p119_p7 = scmp.lt.s32.totalorder %s1139_s15, 7 }
   0xa   : > { %p1203_p6 = por %p112_p3, %p40_p0  ;;  %s1141_s21 = smov [#allocation5]  }
   0xb   : > { %s1408_s18 = scalar_select %p1198_p4, 1, 0 }
   0xc   : > { %s1409_s19 = scalar_select %p1203_p6, 1, 0 }
   0xd   : > { %p1208_p8 = pnand %p760_p5, %p119_p7  ;;  %s131_s22 = sshll.u32 %s1141_s21, 4  ;;  %s132_s22 = int_to_ptr.vmem [resolvable:$true] %s131_s22 }
   0xe   : > { %s1142_s24 = smov [#allocation7]   ;;  %s983_s28 = scalar_lea.hbm %s1402_s1, 8192 }
   0xf   : > { %s1410_s20 = scalar_select %p1208_p8, 1, 0 }
  0x10   : > { %p921_p9 = pneg %p1208_p8  ;;  %s144_s25 = sshll.u32 %s1142_s24, 4  ;;  %s1220_s25 = int_to_ptr.vmem [resolvable:$true] %s144_s25 }
  0x11   : > { %p984_p11 = scmp.ne.s32.totalorder %s1402_s1, %s983_s28  ;;  %p990_p3 = scmp.lt.u32.totalorder %s983_s28, %s1402_s1 }
  0x12   : > { %p1216_p10 = pnand %p921_p9, %p1405_p1 }
  0x14   : > { %p985_p12 = pneg %p1216_p10 }
  0x16   : > { %p986_p13 = pnand %p985_p12, %p984_p11 }
  0x18   : > { %p987_p0 = pneg %p986_p13 }
  0x1a   : > { %p992_p5 = pnand %p990_p3, %p987_p0 }
  0x1c   : > { %995 = shalt.err (!%p992_p5)
}
  0x1d   : > { %s996_s6 = scalar_lea.vmem %s132_s22, 8192  ;;  %p1004_p2 = scmp.lt.s32.totalorder %s132_s22, %s132_s22 }
  0x1e   : > { %p997_p7 = scmp.ne.s32.totalorder %s132_s22, %s996_s6  ;;  %p1005_p6 = scmp.lt.s32.totalorder %s996_s6, %s996_s6 }
  0x20   : > { %p999_p9 = pnand %p997_p7, %p985_p12  ;;  %p1006_p4 = por %p1005_p6, %p1004_p2 }
  0x22   : > { %p1000_p1 = pneg %p999_p9 }
  0x24   : > { %p1007_p8 = pnand %p1006_p4, %p1000_p1 }
  0x26   : > { %1010 = shalt.err (!%p1007_p8)
}
  0x27   : > { %s1143_s7 = smov 512   ;;  %s1144_s8 = smov 32  }
  0x28   : > { %924 = dma.hbm_to_vmem [thread:$0]  (!%p1216_p10), %s1402_s1, 8192, %s132_s22, [#allocation6], %s1143_s7, %s1143_s7, %s1144_s8  }
  0x29   : > { %s1011_s21 = scalar_lea.hbm %s1403_s2, 8192 }
  0x2a   : > { %p1012_p11 = scmp.ne.s32.totalorder %s1403_s2, %s1011_s21  ;;  %p1018_p4 = scmp.lt.u32.totalorder %s1011_s21, %s1403_s2 }
  0x2c   : > { %p1014_p1 = pnand %p1012_p11, %p985_p12 }
  0x2e   : > { %p1015_p2 = pneg %p1014_p1 }
  0x30   : > { %p1020_p6 = pnand %p1018_p4, %p1015_p2 }
  0x32   : > { %1023 = shalt.err (!%p1020_p6)
}
  0x33   : > { %s1024_s22 = scalar_lea.vmem %s1220_s25, 8192  ;;  %p1032_p3 = scmp.lt.s32.totalorder %s1220_s25, %s1220_s25 }
  0x34   : > { %p1025_p8 = scmp.ne.s32.totalorder %s1220_s25, %s1024_s22  ;;  %p1033_p5 = scmp.lt.s32.totalorder %s1024_s22, %s1024_s22 }
  0x36   : > { %p1027_p13 = pnand %p1025_p8, %p985_p12  ;;  %p1034_p7 = por %p1033_p5, %p1032_p3 }
  0x38   : > { %p1028_p0 = pneg %p1027_p13 }
  0x3a   : > { %p1035_p9 = pnand %p1034_p7, %p1028_p0 }
  0x3c   : > { %1038 = shalt.err (!%p1035_p9)
}
  0x3d   : > { %927 = dma.hbm_to_vmem [thread:$0]  (!%p1216_p10), %s1403_s2, 8192, %s1220_s25, [#allocation6], %s1143_s7, %s1143_s7, %s1144_s8  }
  0x3e   : > { %s1270_s4 = sadd.s32 1, %s1139_s15   ;;  %s27_s23 = sadd.s32 1, %s1135_s14 }
  0x3f   : > { %s24_s5 = ssub.s32 %s1139_s15, %s1270_s4  ;;  %p34_p12 = scmp.ne.s32.totalorder %s1135_s14, %s1131_s13 }
  0x40   : > { %p25_p11 = scmp.eq.s32.totalorder %s24_s5, 0  ;;  %p35_p1 = scmp.eq.s32.totalorder %s1139_s15, 0 }
  0x41   : > { %p1412_p2 = scmp.eq.s32.totalorder %s1189_s16, 5  ;;  %p938_p6 = scmp.lt.s32.totalorder %s1139_s15, 6 }
  0x42   : > { %s1286_s9 = scalar_select %p25_p11, %s1135_s14, %s27_s23  }
  0x43   : > { %p1280_p4 = por %p1412_p2, %p34_p12  ;;  %p36_p8 = por %p35_p1, %p34_p12 }
  0x44   : > { %s158_s10 = sand.u32 1, %s1135_s14   ;;  %s765_s25 = sshll.u32 %s1139_s15, 7 }
  0x45   : > { %s764_s11 = sshll.u32 %s158_s10, 3  ;;  %s1293_s17 = scalar_lea.hbm %s1401_s0, %s765_s25 }
  0x46   : > { %s162_s21 = scalar_lea.vmem [#allocation2], %s764_s11  ;;  %p1297_p10 = pnand %p938_p6, %p36_p8 }
  0x47   : > { %s169_s24 = sshll.u32 %s162_s21, 4  ;;  %s159_s27 = scalar_lea.sflag [#allocation3], %s158_s10  ;;  %s1295_s24 = int_to_ptr.vmem [resolvable:$true] %s169_s24 }
  0x48   : > { %s1039_s28 = scalar_lea.hbm %s1293_s17, 128  ;;  %p1041_p0 = pneg %p1297_p10 }
  0x49   : > { %p1040_p13 = scmp.ne.s32.totalorder %s1293_s17, %s1039_s28  ;;  %s1044_s30 = scalar_lea.hbm %s1401_s0, 768 }
  0x4a   : > { %p1045_p7 = scmp.lt.u32.totalorder %s1293_s17, %s1401_s0  ;;  %p1046_p9 = scmp.lt.u32.totalorder %s1044_s30, %s1039_s28 }
  0x4b   : > { %p1042_p3 = pnand %p1041_p0, %p1040_p13  ;;  %p1048_p11 = scmp.lt.u32.totalorder %s1039_s28, %s1293_s17 }
  0x4c   : > { %p1047_p12 = por %p1046_p9, %p1045_p7 }
  0x4d   : > { %p1043_p5 = pneg %p1042_p3 }
  0x4e   : > { %p1049_p1 = por %p1048_p11, %p1047_p12 }
  0x50   : > { %p1050_p2 = pnand %p1049_p1, %p1043_p5 }
  0x52   : > { %1053 = shalt.err (!%p1050_p2)
}
  0x53   : > { %s1054_s10 = scalar_lea.vmem %s1295_s24, 128  ;;  %s1145_s11 = smov [#allocation2]  }
  0x54   : > { %p1055_p6 = scmp.ne.s32.totalorder %s1295_s24, %s1054_s10  ;;  %s1059_s25 = sshll.u32 %s1145_s11, 4  ;;  %s1060_s25 = int_to_ptr.vmem [resolvable:$false] %s1059_s25 }
  0x55   : > { %s1061_s7 = scalar_lea.vmem %s1060_s25, 256  ;;  %p1062_p3 = scmp.lt.s32.totalorder %s1295_s24, %s1060_s25 }
  0x56   : > { %p1057_p8 = pnand %p1055_p6, %p1041_p0  ;;  %p1063_p7 = scmp.lt.s32.totalorder %s1061_s7, %s1054_s10 }
  0x58   : > { %p1058_p13 = pneg %p1057_p8  ;;  %p1064_p9 = por %p1063_p7, %p1062_p3 }
  0x5a   : > { %p1065_p12 = pnand %p1064_p9, %p1058_p13 }
  0x5c   : > { %1068 = shalt.err (!%p1065_p12)
}
  0x5d   : > { %931 = dma.hbm_to_vmem [thread:$0]  (!%p1297_p10), %s1293_s17, 128, %s1295_s24, %s159_s27  }
  0x5e   : > { %p1415_p5 = scmp.ne.s32.totalorder %s1410_s20, 0 }
  0x5f   : > { %s1329_s8 = sand.u32 (!%p1415_p5), 1, %s1131_s13   ;;  %p1416_p0 = scmp.ne.s32.totalorder (!%p1415_p5), %s1408_s18, 0 }
  0x60   : > { %178 = sbr.rel (%p1415_p5) target bundleno = 422 (0x1a6), region = 32  ;;  %s767_s21 = sshll.u32 (!%p1415_p5), %s1329_s8, 3 }
  0x61   : > { %s181_s28 = scalar_lea.sflag (!%p1415_p5), [#allocation3], %s1329_s8  ;;  %s1333_s22 = scalar_lea.vmem (!%p1415_p5), [#allocation2], %s767_s21 }
  0x67   : > { %1114 = dma.done.wait (%p1416_p0), %s181_s28, 128  }
  0x68   : > { %1116 = vsyncadd (%p1416_p0), %s181_s28, 4294967168  ;;  %p1417_p10 = scmp.eq.s32.totalorder %s1189_s16, 0 }
  0x6a   : > { %1118 = dma.done.wait (%p1417_p10), [#allocation6], 16384   ;;  %p1418_p11 = pmov %p1417_p10 }
  0x6b   : > { %v1146_v0 = vmov 0.0   ;;  %v286_v1 = vld [vmem:[#allocation7 + $0x8] sm:$0xff]  ;;  %v288_v3 = vld [vmem:[#allocation7 + $0x18] sm:$0xff]  ;;  %v285_v6 = vld [vmem:[#allocation7] sm:$0xff]  ;;  %s770_s18 = sshll.u32 %s1329_s8, 4  ;;  %s776_s20 = sshll.u32 %s1189_s16, 8 }
  0x6c   : > { %1120 = vsyncadd (%p1418_p11), [#allocation6], 4294950912  ;;  %413 = vmatprep.mubr.f32.mxu0 %v1146_v0  ;;  %484 = vmatprep.mubr.f32.mxu1 %v1146_v0  ;;  %v290_v2 = vld [vmem:[#allocation7 + $0x28] sm:$0xff]  ;;  %v292_v5 = vld [vmem:[#allocation7 + $0x38] sm:$0xff]  ;;  %s214_s17 = scalar_lea.vmem [#allocation8], %s770_s18  ;;  %s1358_s29 = scalar_lea.hbm %s1404_s3, %s776_s20 }
  0x6d   : > { %v777_v4 = vpack.c.bf16 %v290_v2, %v286_v1  ;;  %v289_v7 = vld [vmem:[#allocation7 + $0x20] sm:$0xff]  ;;  %v809_v8 = vpack.c.bf16 %v292_v5, %v288_v3  ;;  %v287_v10 = vld [vmem:[#allocation7 + $0x10] sm:$0xff]  ;;  %v294_v12 = vld [vmem:[#allocation7 + $0x48] sm:$0xff]  ;;  %s670_s24 = sshll.u32 %s214_s17, 4  ;;  %s656_s16 = scalar_lea.sflag [#allocation4], %s1329_s8  ;;  %s1360_s24 = int_to_ptr.vmem [resolvable:$true] %s670_s24 }
  0x6e   : > { %v779_v9 = vpack.c.bf16 %v289_v7, %v285_v6  ;;  %v291_v11 = vld [vmem:[#allocation7 + $0x30] sm:$0xff]  ;;  %v298_v14 = vld [vmem:[#allocation7 + $0x68] sm:$0xff]  ;;  %v296_v15 = vld [vmem:[#allocation7 + $0x58] sm:$0xff]  ;;  %s1069_s30 = scalar_lea.vmem %s1360_s24, 256  ;;  %s1147_s23 = smov [#allocation8]  }
  0x6f   : > { %778 = vmatprep.subr.bf16.mxu0 %v777_v4  ;;  %v811_v13 = vpack.c.bf16 %v291_v11, %v287_v10  ;;  %v300_v16 = vld [vmem:[#allocation7 + $0x78] sm:$0xff]  ;;  %810 = vmatprep.subr.bf16.mxu1 %v809_v8  ;;  %v781_v17 = vpack.c.bf16 %v298_v14, %v294_v12  ;;  %v293_v19 = vld [vmem:[#allocation7 + $0x40] sm:$0xff]  ;;  %v295_v21 = vld [vmem:[#allocation7 + $0x50] sm:$0xff]  ;;  %p1070_p1 = scmp.ne.s32.totalorder %s1360_s24, %s1069_s30  ;;  %s1073_s5 = sshll.u32 %s1147_s23, 4  ;;  %s1074_s5 = int_to_ptr.vmem [resolvable:$false] %s1073_s5 }
  0x70   : > { %780 = vmatpush1.bf16.msra.mxu0 %v779_v9  ;;  %v813_v18 = vpack.c.bf16 %v300_v16, %v296_v15  ;;  %v297_v20 = vld [vmem:[#allocation7 + $0x60] sm:$0xff]  ;;  %v299_v23 = vld [vmem:[#allocation7 + $0x70] sm:$0xff]  ;;  %v302_v24 = vld [vmem:[#allocation7 + $0x88] sm:$0xff]  ;;  %s1075_s10 = scalar_lea.vmem %s1074_s5, 512  ;;  %p1076_p8 = scmp.lt.s32.totalorder %s1360_s24, %s1074_s5 }
  0x71   : > { %812 = vmatpush1.bf16.msra.mxu1 %v811_v13  ;;  %v783_v22 = vpack.c.bf16 %v297_v20, %v293_v19  ;;  %v306_v25 = vld [vmem:[#allocation7 + $0xa8] sm:$0xff]  ;;  %782 = vmatprep.subr.bf16.mxu0 %v781_v17  ;;  %v815_v26 = vpack.c.bf16 %v299_v23, %v295_v21  ;;  %v304_v28 = vld [vmem:[#allocation7 + $0x98] sm:$0xff]  ;;  %v301_v30 = vld [vmem:[#allocation7 + $0x80] sm:$0xff]  ;;  %p1071_p2 = pnand %p1070_p1, %p1280_p4  ;;  %p1077_p13 = scmp.lt.s32.totalorder %s1075_s10, %s1069_s30 }
  0x72   : > { %814 = vmatprep.subr.bf16.mxu1 %v813_v18  ;;  %v785_v27 = vpack.c.bf16 %v306_v25, %v302_v24  ;;  %v308_v29 = vld [vmem:[#allocation7 + $0xb8] sm:$0xff]  ;;  %v305_v32 = vld [vmem:[#allocation7 + $0xa0] sm:$0xff]  ;;  %v303_v33 = vld [vmem:[#allocation7 + $0x90] sm:$0xff] }
  0x73   : > { %v817_v31 = vpack.c.bf16 %v308_v29, %v304_v28  ;;  %v307_v34 = vld [vmem:[#allocation7 + $0xb0] sm:$0xff]  ;;  %v787_v35 = vpack.c.bf16 %v305_v32, %v301_v30  ;;  %v310_v36 = vld [vmem:[#allocation7 + $0xc8] sm:$0xff]  ;;  %v312_v38 = vld [vmem:[#allocation7 + $0xd8] sm:$0xff]  ;;  %p1072_p6 = pneg %p1071_p2  ;;  %p1078_p3 = por %p1077_p13, %p1076_p8 }
  0x74   : > { %784 = vmatpush1.bf16.msra.mxu0 %v783_v22  ;;  %v314_v37 = vld [vmem:[#allocation7 + $0xe8] sm:$0xff]  ;;  %v819_v39 = vpack.c.bf16 %v307_v34, %v303_v33  ;;  %v316_v41 = vld [vmem:[#allocation7 + $0xf8] sm:$0xff]  ;;  %v309_v42 = vld [vmem:[#allocation7 + $0xc0] sm:$0xff] }
  0x75   : > { %816 = vmatpush1.bf16.msra.mxu1 %v815_v26  ;;  %786 = vmatprep.subr.bf16.mxu0 %v785_v27  ;;  %v789_v40 = vpack.c.bf16 %v314_v37, %v310_v36  ;;  %v313_v43 = vld [vmem:[#allocation7 + $0xe0] sm:$0xff]  ;;  %v821_v44 = vpack.c.bf16 %v316_v41, %v312_v38  ;;  %v311_v45 = vld [vmem:[#allocation7 + $0xd0] sm:$0xff]  ;;  %v318_v47 = vld [vmem:[#allocation7 + $0x108] sm:$0xff]  ;;  %p1079_p7 = pnand %p1078_p3, %p1072_p6 }
  0x76   : > { %818 = vmatprep.subr.bf16.mxu1 %v817_v31  ;;  %v315_v46 = vld [vmem:[#allocation7 + $0xf0] sm:$0xff]  ;;  %v322_v48 = vld [vmem:[#allocation7 + $0x128] sm:$0xff]  ;;  %v320_v49 = vld [vmem:[#allocation7 + $0x118] sm:$0xff]  ;;  %v791_v51 = vpack.c.bf16 %v313_v43, %v309_v42 }
  0x77   : > { %v324_v50 = vld [vmem:[#allocation7 + $0x138] sm:$0xff]  ;;  %v823_v52 = vpack.c.bf16 %v315_v46, %v311_v45  ;;  %v793_v53 = vpack.c.bf16 %v322_v48, %v318_v47  ;;  %v317_v54 = vld [vmem:[#allocation7 + $0x100] sm:$0xff]  ;;  %v319_v56 = vld [vmem:[#allocation7 + $0x110] sm:$0xff] }
  0x78   : > { %788 = vmatpush1.bf16.msra.mxu0 %v787_v35  ;;  %v321_v55 = vld [vmem:[#allocation7 + $0x120] sm:$0xff]  ;;  %v825_v57 = vpack.c.bf16 %v324_v50, %v320_v49  ;;  %v323_v58 = vld [vmem:[#allocation7 + $0x130] sm:$0xff]  ;;  %v326_v59 = vld [vmem:[#allocation7 + $0x148] sm:$0xff] }
  0x79   : > { %820 = vmatpush1.bf16.msra.mxu1 %v819_v39  ;;  %790 = vmatprep.subr.bf16.mxu0 %v789_v40  ;;  %v330_v60 = vld [vmem:[#allocation7 + $0x168] sm:$0xff]  ;;  %v328_v61 = vld [vmem:[#allocation7 + $0x158] sm:$0xff]  ;;  %v795_v63 = vpack.c.bf16 %v321_v55, %v317_v54  ;;  %v827_v1 = vpack.c.bf16 %v323_v58, %v319_v56  ;;  %v325_v3 = vld [vmem:[#allocation7 + $0x140] sm:$0xff] }
  0x7a   : > { %822 = vmatprep.subr.bf16.mxu1 %v821_v44  ;;  %v332_v62 = vld [vmem:[#allocation7 + $0x178] sm:$0xff]  ;;  %v797_v2 = vpack.c.bf16 %v330_v60, %v326_v59  ;;  %v329_v4 = vld [vmem:[#allocation7 + $0x160] sm:$0xff]  ;;  %v327_v5 = vld [vmem:[#allocation7 + $0x150] sm:$0xff] }
  0x7b   : > { %v829_v6 = vpack.c.bf16 %v332_v62, %v328_v61  ;;  %v331_v7 = vld [vmem:[#allocation7 + $0x170] sm:$0xff]  ;;  %v334_v8 = vld [vmem:[#allocation7 + $0x188] sm:$0xff]  ;;  %v336_v10 = vld [vmem:[#allocation7 + $0x198] sm:$0xff]  ;;  %v799_v12 = vpack.c.bf16 %v329_v4, %v325_v3 }
  0x7c   : > { %792 = vmatpush1.bf16.msra.mxu0 %v791_v51  ;;  %v338_v9 = vld [vmem:[#allocation7 + $0x1a8] sm:$0xff]  ;;  %v340_v11 = vld [vmem:[#allocation7 + $0x1b8] sm:$0xff]  ;;  %v831_v13 = vpack.c.bf16 %v331_v7, %v327_v5  ;;  %v333_v15 = vld [vmem:[#allocation7 + $0x180] sm:$0xff] }
  0x7d   : > { %824 = vmatpush1.bf16.msra.mxu1 %v823_v52  ;;  %794 = vmatprep.subr.bf16.mxu0 %v793_v53  ;;  %v801_v14 = vpack.c.bf16 %v338_v9, %v334_v8  ;;  %v337_v16 = vld [vmem:[#allocation7 + $0x1a0] sm:$0xff]  ;;  %v335_v17 = vld [vmem:[#allocation7 + $0x190] sm:$0xff]  ;;  %v833_v18 = vpack.c.bf16 %v340_v11, %v336_v10  ;;  %v342_v20 = vld [vmem:[#allocation7 + $0x1c8] sm:$0xff] }
  0x7e   : > { %826 = vmatprep.subr.bf16.mxu1 %v825_v57  ;;  %v339_v19 = vld [vmem:[#allocation7 + $0x1b0] sm:$0xff]  ;;  %v346_v21 = vld [vmem:[#allocation7 + $0x1e8] sm:$0xff]  ;;  %v344_v22 = vld [vmem:[#allocation7 + $0x1d8] sm:$0xff]  ;;  %v803_v24 = vpack.c.bf16 %v337_v16, %v333_v15 }
  0x7f   : > { %v348_v23 = vld [vmem:[#allocation7 + $0x1f8] sm:$0xff]  ;;  %v835_v25 = vpack.c.bf16 %v339_v19, %v335_v17  ;;  %v805_v26 = vpack.c.bf16 %v346_v21, %v342_v20  ;;  %v341_v27 = vld [vmem:[#allocation7 + $0x1c0] sm:$0xff]  ;;  %v343_v29 = vld [vmem:[#allocation7 + $0x1d0] sm:$0xff] }
  0x80   : > { %796 = vmatpush1.bf16.msra.mxu0 %v795_v63  ;;  %v345_v28 = vld [vmem:[#allocation7 + $0x1e0] sm:$0xff]  ;;  %v837_v30 = vpack.c.bf16 %v348_v23, %v344_v22  ;;  %v347_v31 = vld [vmem:[#allocation7 + $0x1f0] sm:$0xff]  ;;  %v222_v32 = vld [vmem:[#allocation5 + $0x8] sm:$0xff] }
  0x81   : > { %828 = vmatpush1.bf16.msra.mxu1 %v827_v1  ;;  %798 = vmatprep.subr.bf16.mxu0 %v797_v2  ;;  %v226_v33 = vld [vmem:[#allocation5 + $0x28] sm:$0xff]  ;;  %v224_v34 = vld [vmem:[#allocation5 + $0x18] sm:$0xff]  ;;  %v807_v36 = vpack.c.bf16 %v345_v28, %v341_v27  ;;  %v839_v38 = vpack.c.bf16 %v347_v31, %v343_v29  ;;  %v221_v40 = vld [vmem:[#allocation5] sm:$0xff] }
  0x82   : > { %830 = vmatprep.subr.bf16.mxu1 %v829_v6  ;;  %v228_v35 = vld [vmem:[#allocation5 + $0x38] sm:$0xff]  ;;  %v841_v39 = vpack.c.bf16 %v226_v33, %v222_v32  ;;  %v225_v41 = vld [vmem:[#allocation5 + $0x20] sm:$0xff]  ;;  %v223_v42 = vld [vmem:[#allocation5 + $0x10] sm:$0xff] }
  0x83   : > { %v1346_v37 = vld [vmem:[%s1333_s22] sm:$0xff]  ;;  %v873_v43 = vpack.c.bf16 %v228_v35, %v224_v34  ;;  %v230_v45 = vld [vmem:[#allocation5 + $0x48] sm:$0xff]  ;;  %v843_v50 = vpack.c.bf16 %v225_v41, %v221_v40  ;;  %v229_v53 = vld [vmem:[#allocation5 + $0x40] sm:$0xff] }
  0x84   : > { %800 = vmatpush1.bf16.msra.mxu0 %v799_v12  ;;  %v227_v44 = vld [vmem:[#allocation5 + $0x30] sm:$0xff]  ;;  %v234_v46 = vld [vmem:[#allocation5 + $0x68] sm:$0xff]  ;;  %v217_v47 = vrot.slane %v1346_v37, 1  ;;  %v232_v48 = vld [vmem:[#allocation5 + $0x58] sm:$0xff] }
  0x85   : > { %832 = vmatpush1.bf16.msra.mxu1 %v831_v13  ;;  %802 = vmatprep.subr.bf16.mxu0 %v801_v14  ;;  %v236_v49 = vld [vmem:[#allocation5 + $0x78] sm:$0xff]  ;;  %v875_v51 = vpack.c.bf16 %v227_v44, %v223_v42  ;;  %v845_v52 = vpack.c.bf16 %v234_v46, %v230_v45  ;;  %v233_v54 = vld [vmem:[#allocation5 + $0x60] sm:$0xff]  ;;  %v231_v55 = vld [vmem:[#allocation5 + $0x50] sm:$0xff] }
  0x86   : > { %834 = vmatprep.subr.bf16.mxu1 %v833_v18  ;;  %v877_v56 = vpack.c.bf16 %v236_v49, %v232_v48  ;;  %v235_v57 = vld [vmem:[#allocation5 + $0x70] sm:$0xff]  ;;  %v238_v58 = vld [vmem:[#allocation5 + $0x88] sm:$0xff]  ;;  %v240_v60 = vld [vmem:[#allocation5 + $0x98] sm:$0xff]  ;;  %v847_v62 = vpack.c.bf16 %v233_v54, %v229_v53 }
  0x87   : > { %v242_v59 = vld [vmem:[#allocation5 + $0xa8] sm:$0xff]  ;;  %v244_v61 = vld [vmem:[#allocation5 + $0xb8] sm:$0xff]  ;;  %v879_v63 = vpack.c.bf16 %v235_v57, %v231_v55  ;;  %v237_v2 = vld [vmem:[#allocation5 + $0x80] sm:$0xff] }
  0x88   : > { %804 = vmatpush1.bf16.msra.mxu0 %v803_v24  ;;  %v849_v1 = vpack.c.bf16 %v242_v59, %v238_v58  ;;  %v241_v3 = vld [vmem:[#allocation5 + $0xa0] sm:$0xff]  ;;  %v239_v4 = vld [vmem:[#allocation5 + $0x90] sm:$0xff]  ;;  %v881_v5 = vpack.c.bf16 %v244_v61, %v240_v60  ;;  %v246_v7 = vld [vmem:[#allocation5 + $0xc8] sm:$0xff] }
  0x89   : > { %836 = vmatpush1.bf16.msra.mxu1 %v835_v25  ;;  %806 = vmatprep.subr.bf16.mxu0 %v805_v26  ;;  %v243_v6 = vld [vmem:[#allocation5 + $0xb0] sm:$0xff]  ;;  %v250_v8 = vld [vmem:[#allocation5 + $0xe8] sm:$0xff]  ;;  %v248_v9 = vld [vmem:[#allocation5 + $0xd8] sm:$0xff]  ;;  %v851_v11 = vpack.c.bf16 %v241_v3, %v237_v2 }
  0x8a   : > { %838 = vmatprep.subr.bf16.mxu1 %v837_v30  ;;  %v252_v10 = vld [vmem:[#allocation5 + $0xf8] sm:$0xff]  ;;  %v883_v12 = vpack.c.bf16 %v243_v6, %v239_v4  ;;  %v853_v13 = vpack.c.bf16 %v250_v8, %v246_v7  ;;  %v245_v14 = vld [vmem:[#allocation5 + $0xc0] sm:$0xff]  ;;  %v247_v16 = vld [vmem:[#allocation5 + $0xd0] sm:$0xff] }
  0x8b   : > { %v249_v15 = vld [vmem:[#allocation5 + $0xe0] sm:$0xff]  ;;  %v885_v17 = vpack.c.bf16 %v252_v10, %v248_v9  ;;  %v251_v18 = vld [vmem:[#allocation5 + $0xf0] sm:$0xff]  ;;  %v254_v19 = vld [vmem:[#allocation5 + $0x108] sm:$0xff] }
  0x8c   : > { %808 = vmatpush1.bf16.msra.mxu0 %v807_v36  ;;  %v258_v20 = vld [vmem:[#allocation5 + $0x128] sm:$0xff]  ;;  %v256_v21 = vld [vmem:[#allocation5 + $0x118] sm:$0xff]  ;;  %v855_v23 = vpack.c.bf16 %v249_v15, %v245_v14  ;;  %v253_v25 = vld [vmem:[#allocation5 + $0x100] sm:$0xff] }
  0x8d   : > { %840 = vmatpush1.bf16.msra.mxu1 %v839_v38  ;;  %842 = vmatprep.subr.bf16.mxu0 %v841_v39  ;;  %v260_v22 = vld [vmem:[#allocation5 + $0x138] sm:$0xff]  ;;  %v857_v24 = vpack.c.bf16 %v258_v20, %v254_v19  ;;  %v257_v26 = vld [vmem:[#allocation5 + $0x120] sm:$0xff]  ;;  %v255_v27 = vld [vmem:[#allocation5 + $0x110] sm:$0xff] }
  0x8e   : > { %874 = vmatprep.subr.bf16.mxu1 %v873_v43  ;;  %v889_v28 = vpack.c.bf16 %v260_v22, %v256_v21  ;;  %v259_v29 = vld [vmem:[#allocation5 + $0x130] sm:$0xff]  ;;  %v262_v30 = vld [vmem:[#allocation5 + $0x148] sm:$0xff]  ;;  %v264_v32 = vld [vmem:[#allocation5 + $0x158] sm:$0xff]  ;;  %v859_v34 = vpack.c.bf16 %v257_v26, %v253_v25 }
  0x8f   : > { %414 = vmatmul.mubr.f32.vlgmr.msra.gmra.mrb[0].mxu0 %v217_v47  ;;  %v266_v31 = vld [vmem:[#allocation5 + $0x168] sm:$0xff]  ;;  %v268_v33 = vld [vmem:[#allocation5 + $0x178] sm:$0xff]  ;;  %v891_v35 = vpack.c.bf16 %v259_v29, %v255_v27  ;;  %v261_v38 = vld [vmem:[#allocation5 + $0x140] sm:$0xff] }
  0x90   : > { %485 = vmatmul.mubr.f32.vlgmr.msra.gmra.mrb[0].mxu1 %v217_v47  ;;  %844 = vmatpush1.bf16.msra.mxu0 %v843_v50  ;;  %v861_v36 = vpack.c.bf16 %v266_v31, %v262_v30  ;;  %v265_v39 = vld [vmem:[#allocation5 + $0x160] sm:$0xff]  ;;  %v263_v40 = vld [vmem:[#allocation5 + $0x150] sm:$0xff]  ;;  %v893_v41 = vpack.c.bf16 %v268_v33, %v264_v32  ;;  %v270_v43 = vld [vmem:[#allocation5 + $0x188] sm:$0xff] }
  0x91   : > { %876 = vmatpush1.bf16.msra.mxu1 %v875_v51  ;;  %846 = vmatprep.subr.bf16.mxu0 %v845_v52  ;;  %v267_v42 = vld [vmem:[#allocation5 + $0x170] sm:$0xff]  ;;  %v274_v44 = vld [vmem:[#allocation5 + $0x1a8] sm:$0xff]  ;;  %v272_v45 = vld [vmem:[#allocation5 + $0x198] sm:$0xff]  ;;  %v863_v47 = vpack.c.bf16 %v265_v39, %v261_v38 }
  0x92   : > { %878 = vmatprep.subr.bf16.mxu1 %v877_v56  ;;  %555 = vmatprep.mubr.f32.mxu0 %v1146_v0  ;;  %v276_v46 = vld [vmem:[#allocation5 + $0x1b8] sm:$0xff]  ;;  %v895_v48 = vpack.c.bf16 %v267_v42, %v263_v40  ;;  %v865_v49 = vpack.c.bf16 %v274_v44, %v270_v43  ;;  %v269_v50 = vld [vmem:[#allocation5 + $0x180] sm:$0xff]  ;;  %v271_v52 = vld [vmem:[#allocation5 + $0x190] sm:$0xff] }
  0x93   : > { %626 = vmatprep.mubr.f32.mxu1 %v1146_v0  ;;  %v887_v0 = vpack.c.bf16 %v251_v18, %v247_v16  ;;  %v273_v51 = vld [vmem:[#allocation5 + $0x1a0] sm:$0xff]  ;;  %v897_v53 = vpack.c.bf16 %v276_v46, %v272_v45  ;;  %v275_v54 = vld [vmem:[#allocation5 + $0x1b0] sm:$0xff]  ;;  %v278_v55 = vld [vmem:[#allocation5 + $0x1c8] sm:$0xff] }
  0x94   : > { %848 = vmatpush1.bf16.msra.mxu0 %v847_v62  ;;  %v282_v56 = vld [vmem:[#allocation5 + $0x1e8] sm:$0xff]  ;;  %v280_v57 = vld [vmem:[#allocation5 + $0x1d8] sm:$0xff]  ;;  %v867_v59 = vpack.c.bf16 %v273_v51, %v269_v50  ;;  %v899_v60 = vpack.c.bf16 %v275_v54, %v271_v52  ;;  %v277_v62 = vld [vmem:[#allocation5 + $0x1c0] sm:$0xff] }
  0x95   : > { %880 = vmatpush1.bf16.msra.mxu1 %v879_v63  ;;  %850 = vmatprep.subr.bf16.mxu0 %v849_v1  ;;  %v284_v58 = vld [vmem:[#allocation5 + $0x1f8] sm:$0xff]  ;;  %v869_v61 = vpack.c.bf16 %v282_v56, %v278_v55  ;;  %v281_v63 = vld [vmem:[#allocation5 + $0x1e0] sm:$0xff]  ;;  %v279_v2 = vld [vmem:[#allocation5 + $0x1d0] sm:$0xff] }
  0x96   : > { %882 = vmatprep.subr.bf16.mxu1 %v881_v5  ;;  %v901_v1 = vpack.c.bf16 %v284_v58, %v280_v57  ;;  %v283_v3 = vld [vmem:[#allocation5 + $0x1f0] sm:$0xff]  ;;  %v871_v4 = vpack.c.bf16 %v281_v63, %v277_v62 }
  0x97   : > { %v903_v5 = vpack.c.bf16 %v283_v3, %v279_v2 }
  0x98   : > { %852 = vmatpush1.bf16.msra.mxu0 %v851_v11 }
  0x99   : > { %884 = vmatpush1.bf16.msra.mxu1 %v883_v12  ;;  %854 = vmatprep.subr.bf16.mxu0 %v853_v13 }
  0x9a   : > { %886 = vmatprep.subr.bf16.mxu1 %v885_v17 }
  0x9c   : > { %856 = vmatpush1.bf16.msra.mxu0 %v855_v23 }
  0x9d   : > { %888 = vmatpush1.bf16.msra.mxu1 %v887_v0  ;;  %858 = vmatprep.subr.bf16.mxu0 %v857_v24 }
  0x9e   : > { %890 = vmatprep.subr.bf16.mxu1 %v889_v28 }
  0xa0   : > { %860 = vmatpush1.bf16.msra.mxu0 %v859_v34 }
  0xa1   : > { %892 = vmatpush1.bf16.msra.mxu1 %v891_v35  ;;  %862 = vmatprep.subr.bf16.mxu0 %v861_v36 }
  0xa2   : > { %894 = vmatprep.subr.bf16.mxu1 %v893_v41 }
  0xa4   : > { %864 = vmatpush1.bf16.msra.mxu0 %v863_v47 }
  0xa5   : > { %896 = vmatpush1.bf16.msra.mxu1 %v895_v48  ;;  %866 = vmatprep.subr.bf16.mxu0 %v865_v49 }
  0xa6   : > { %898 = vmatprep.subr.bf16.mxu1 %v897_v53 }
  0xa8   : > { %868 = vmatpush1.bf16.msra.mxu0 %v867_v59 }
  0xa9   : > { %900 = vmatpush1.bf16.msra.mxu1 %v899_v60  ;;  %870 = vmatprep.subr.bf16.mxu0 %v869_v61 }
  0xaa   : > { %902 = vmatprep.subr.bf16.mxu1 %v901_v1 }
  0xac   : > { %872 = vmatpush1.bf16.msra.mxu0 %v871_v4 }
  0xad   : > { %904 = vmatpush1.bf16.msra.mxu1 %v903_v5 }
  0xaf   : > { %556 = vmatmul.mubr.f32.vlgmr.msra.gmra.mrb[0].mxu0 %v1346_v37 }
  0xb0   : > { %627 = vmatmul.mubr.f32.vlgmr.msra.gmra.mrb[0].mxu1 %v1346_v37 }
 0x182   : > { %v557_v6 = vpop.f32.mrb[0].mxu0 }
 0x183   : > { %v633_v7 = vmul.f32 %v557_v6, %v557_v6  ;;  %v628_v8 = vpop.f32.mrb[0].mxu1  ;;  %v559_v9 = vpop.f32.mrb[1].mxu0 }
 0x184   : > { %v635_v10 = vmul.f32 %v628_v8, %v628_v8  ;;  %v634_v11 = vmul.f32 %v559_v9, %v559_v9  ;;  %v630_v12 = vpop.f32.mrb[1].mxu1 }
 0x185   : > { %v636_v13 = vmul.f32 %v630_v12, %v630_v12 }
 0x186   : > { %v637_v14 = vadd.f32 %v635_v10, %v633_v7 }
 0x187   : > { %v638_v15 = vadd.f32 %v636_v13, %v634_v11 }
 0x188   : > { %979 = vrsqrt.f32 %v637_v14  ;;  %vm641_vm0 = vcmp.eq.f32.partialorder %v637_v14, inf  ;;  %v644_v37 = vand.u32 2147483648, %v637_v14  ;;  %vm643_vm1 = vcmp.eq.f32.partialorder %v637_v14, 0.0 }
 0x189   : > { %981 = vrsqrt.f32 %v638_v15  ;;  %vm648_vm2 = vcmp.eq.f32.partialorder %v638_v15, inf  ;;  %v651_v21 = vand.u32 2147483648, %v638_v15  ;;  %vm650_vm3 = vcmp.eq.f32.partialorder %v638_v15, 0.0 }
 0x192   : > { %v980_v16 = vpop.eup %979 }
 0x193   : > { %v982_v17 = vpop.eup %981  ;;  %v640_v18 = vmul.f32 %v980_v16, %v637_v14 }
 0x194   : > { %v647_v19 = vmul.f32 %v982_v17, %v638_v15 }
 0x195   : > { %v642_v20 = vsel %vm641_vm0, %v637_v14, %v640_v18 }
 0x196   : > { %v645_v22 = vsel %vm643_vm1, %v644_v37, %v642_v20  ;;  %v649_v23 = vsel %vm648_vm2, %v638_v15, %v647_v19 }
 0x197   : > { %v652_v0 = vsel %vm650_vm3, %v651_v21, %v649_v23  ;;  %653 = vst [vmem:[%s214_s17] sm:$0xff] %v645_v22 }
 0x198   : > { %654 = vst [vmem:[%s214_s17 + $0x8] sm:$0xff] %v652_v0 }
 0x199   : > { %1082 = shalt.err (!%p1079_p7)
}
 0x19a   : > { %s1083_s11 = scalar_lea.hbm %s1358_s29, 256  ;;  %s1087_s8 = scalar_lea.hbm %s1404_s3, 1536 }
 0x19b   : > { %p1084_p9 = scmp.ne.s32.totalorder %s1358_s29, %s1083_s11  ;;  %p1088_p0 = scmp.lt.u32.totalorder %s1358_s29, %s1404_s3 }
 0x19c   : > { %p1089_p10 = scmp.lt.u32.totalorder %s1087_s8, %s1083_s11  ;;  %p1091_p1 = scmp.lt.u32.totalorder %s1083_s11, %s1358_s29 }
 0x19d   : > { %p1085_p12 = pnand %p1084_p9, %p1280_p4 }
 0x19e   : > { %p1090_p11 = por %p1089_p10, %p1088_p0 }
 0x19f   : > { %p1086_p5 = pneg %p1085_p12 }
 0x1a0   : > { %p1092_p2 = por %p1091_p1, %p1090_p11 }
 0x1a2   : > { %p1093_p6 = pnand %p1092_p2, %p1086_p5 }
 0x1a4   : > { %1096 = shalt.err (!%p1093_p6)
}
 0x1a5   : > { %919 = dma.vmem_to_hbm [thread:$0]  (%p1280_p4), %s1360_s24, 256, %s1358_s29, %s656_s16  }
 0x1a6 PF: > { %p941_p8 = scmp.ge.s32.totalorder %s1139_s15, 2  ;;  %s682_s22 = sand.u32 1, %s1127_s12  }
 0x1a7   : > { %p1419_p13 = scmp.ne.s32.totalorder %s1409_s19, 0  ;;  %s683_s18 = scalar_lea.sflag [#allocation4], %s682_s22 }
 0x1a9   : > { %p933_p3 = pnand %p941_p8, %p1419_p13 }
 0x1ab   : > { %1122 = dma.done.wait (!%p933_p3), %s683_s18, 256  }
 0x1ac   : > { %1124 = vsyncadd (!%p933_p3), %s683_s18, 4294967040  ;;  %p17_p7 = scmp.ge.s32.totalorder %s1270_s4, 8   ;;  %s1420_s12 = smov %s1131_s13 }
 0x1ad   : > { %s1421_s13 = smov %s1135_s14  ;;  %s1422_s14 = smov %s1286_s9 }
 0x1ae   : > { %s1423_s15 = smov %s1270_s4  ;;  %19 = sbr.rel (!%p17_p7) target bundleno = 6 (0x6), region = 85 }
 0x1b5   :  { %688 = vsyncpa [#allocation3], 1 }
 0x1b6   :  { %690 = vsyncpa [#allocation3 + $0x1], 1 }
 0x1b7   :  { %691 = vsyncpa [#allocation6], 1 }
 0x1b8   :  { %692 = vsyncpa [#allocation4], 1 }
 0x1b9   :  { %694 = vsyncpa [#allocation4 + $0x1], 1 }

</bundles_post_ra>
